<compile_context>
chip_gen: v7x
topology: tpu7x:2x2x1
jax: 0.10.0
libtpu: 0.0.40
codegen_flags: <defaults>
</compile_context>

<pallas_src>
import jax
import jax.numpy as jnp
from jax.experimental import pallas as pl
from jax.experimental.pallas import tpu as pltpu

_LANES = 128
# Per-block VMEM footprint target; with double-buffered input + output this is
# ~4x => 8 MiB, comfortably inside every generation's scoped VMEM budget.
_TARGET_BLOCK_BYTES = 2 * 1024 * 1024
# Explicit scoped-VMEM cap: safe on v5e/v6e (128 MiB physical) and v7x (64 MiB).
_VMEM_LIMIT_BYTES = 32 * 1024 * 1024


def _copy_kernel(x_ref, o_ref):
    # Identity on the current (tile_rows, 128) tile — all the module "computes".
    o_ref[...] = x_ref[...]


def _sublane_multiple(dtype) -> int:
    # Minimum sublane tiling per dtype width: 8 (4B), 16 (2B), 32 (1B).
    return max(8, 32 // jnp.dtype(dtype).itemsize)


@jax.jit
def residual_copy(x: jax.Array) -> jax.Array:
    """Materialize a device copy of `x` via a lane-dense tiled Pallas kernel.

    Works for any shape / dtype: flattens, pads to a (sublane*128) boundary,
    copies as (rows, 128) tiles, then slices/reshapes back.
    """
    if x.size == 0:
        return x  # nothing to copy

    orig_shape = x.shape
    dtype = x.dtype
    itemsize = jnp.dtype(dtype).itemsize
    sublane = _sublane_multiple(dtype)

    total = x.size
    chunk = sublane * _LANES
    padded_total = ((total + chunk - 1) // chunk) * chunk
    flat = x.reshape(-1)
    if padded_total != total:
        flat = jnp.pad(flat, (0, padded_total - total))
    rows = padded_total // _LANES
    mat = flat.reshape(rows, _LANES)

    # Pick the largest dtype-aligned tile that fits the per-block byte budget.
    bytes_per_row = _LANES * itemsize
    tile_rows = (_TARGET_BLOCK_BYTES // bytes_per_row) // sublane * sublane
    tile_rows = max(sublane, min(tile_rows, rows))
    # Keep at least 2 grid steps when there is enough work so both v7x
    # TensorCores can take part (near-neutral on single-TC v5e/v6e).
    if rows >= 2 * sublane:
        half = ((rows // 2) + sublane - 1) // sublane * sublane
        tile_rows = min(tile_rows, max(sublane, half))

    grid = (pl.cdiv(rows, tile_rows),)

    out = pl.pallas_call(
        _copy_kernel,
        out_shape=jax.ShapeDtypeStruct((rows, _LANES), dtype),
        grid_spec=pl.GridSpec(
            grid=grid,
            in_specs=[pl.BlockSpec((tile_rows, _LANES), lambda i: (i, 0))],
            out_specs=pl.BlockSpec((tile_rows, _LANES), lambda i: (i, 0)),
        ),
        compiler_params=pltpu.CompilerParams(
            dimension_semantics=("parallel",),
            vmem_limit_bytes=_VMEM_LIMIT_BYTES,
        ),
    )(mat)

    return out.reshape(-1)[:total].reshape(orig_shape)


class Residual:
    """JAX/Pallas port of the graphgps Residual layer.

    forward(batch): if buffer_name not in batch, create an empty list; append
    batch[field_name] to it; return batch.

    materialize_copy=True appends a Pallas-produced copy (exercises the kernel);
    materialize_copy=False appends the array by reference, which — JAX arrays
    being immutable — matches the torch append-by-reference semantics exactly
    at zero HBM cost.
    """

    def __init__(self, field_name: str = "x", buffer_name: str = "residual_sum",
                 materialize_copy: bool = True):
        self.field_name = field_name
        self.buffer_name = buffer_name
        self.materialize_copy = materialize_copy

    def forward(self, batch: dict) -> dict:
        if self.buffer_name not in batch:
            batch[self.buffer_name] = []
        val = batch[self.field_name]
        if self.materialize_copy:
            val = residual_copy(val)
        # TODO(synk): torch appends by reference; with materialize_copy=False we
        # do exactly that (immutable arrays make it semantically identical).
        batch[self.buffer_name].append(val)
        return batch

    __call__ = forward


if __name__ == "__main__":
    key = jax.random.PRNGKey(0)
    k0, k1 = jax.random.split(key)

    # small graph-like batch: 16 nodes, 32-dim features
    x = jax.random.normal(k0, (16, 32), dtype=jnp.float32)
    batch = {"x": x}

    layer = Residual(field_name="x", buffer_name="residual_sum")

    # apply twice to exercise the list-append semantics
    batch = layer(batch)
    batch = layer(batch)

    out0 = jax.block_until_ready(batch["residual_sum"][0])
    out1 = jax.block_until_ready(batch["residual_sum"][1])
    assert len(batch["residual_sum"]) == 2
    assert out0.shape == x.shape and out0.dtype == x.dtype
    assert bool(jnp.all(out0 == x)) and bool(jnp.all(out1 == x))

    # non-aligned shape + bf16 exercises the padding / dtype-aware sublane path
    y = jax.random.normal(k1, (17, 21), dtype=jnp.float32).astype(jnp.bfloat16)
    y_cp = jax.block_until_ready(residual_copy(y))
    assert y_cp.shape == y.shape and y_cp.dtype == y.dtype
    assert bool(jnp.all(y_cp == y))

    # larger lane-dense case: multi-step parallel grid with big tiles
    z = jax.random.normal(k1, (4096, 256), dtype=jnp.float32)
    z_cp = jax.block_until_ready(residual_copy(z))
    assert bool(jnp.all(z_cp == z))

    # zero-copy (reference append) path, matching torch semantics exactly
    batch2 = Residual(materialize_copy=False)({"x": x})
    assert batch2["residual_sum"][0] is x

    print("KERNEL_OK")
</pallas_src>

<mosaic_0001>
module attributes {stable_mosaic.version = 11 : i64} {
  func.func @_copy_kernel(%arg0: i32, %arg1: memref<8x128xf32, #tpu.memory_space<vmem>>, %arg2: memref<8x128xf32, #tpu.memory_space<vmem>>) attributes {dimension_semantics = [#tpu.dimension_semantics<parallel>], iteration_bounds = array<i64: 1>, scalar_prefetch = 0 : i64, scratch_operands = 0 : i64, tpu.core_type = #tpu.core_type<tc>, window_params = [{transform_indices = @transform_0, window_bounds = array<i64: 8, 128>}, {transform_indices = @transform_1, window_bounds = array<i64: 8, 128>}]} {
    %c0 = arith.constant 0 : index
    %c0_0 = arith.constant 0 : index
    %0 = vector.load %arg1[%c0, %c0_0] : memref<8x128xf32, #tpu.memory_space<vmem>>, vector<8x128xf32>
    %c0_1 = arith.constant 0 : index
    %c0_2 = arith.constant 0 : index
    %1 = vector.load %arg2[%c0_1, %c0_2] : memref<8x128xf32, #tpu.memory_space<vmem>>, vector<8x128xf32>
    tpu.vector_store %arg2[%c0_1, %c0_2], %0 {strides = array<i32>} : memref<8x128xf32, #tpu.memory_space<vmem>>, vector<8x128xf32>,
    return
  }
  func.func @transform_0(%arg0: i32) -> (i32, i32) {
    %c0_i32 = arith.constant 0 : i32
    %c0_i32_0 = arith.constant 0 : i32
    return %arg0, %c0_i32 : i32, i32
  }
  func.func @transform_1(%arg0: i32) -> (i32, i32) {
    %c0_i32 = arith.constant 0 : i32
    %c0_i32_0 = arith.constant 0 : i32
    return %arg0, %c0_i32 : i32, i32
  }
}

</mosaic_0001>

<bundles_post_ra>
// kernel: residual_copy.1
= control target key start
LH: loop header
LB: loop body
LE: loop exit
PB: predicated region body
PF: predicated region fallthrough
CT: control target
= control target key end

     0   :  { %s30_s0 = inlined_call_operand.vmem [shape: f32[8,128], index: 0, kind: input, shape index: {}]   ;;  %s31_s1 = inlined_call_operand.vmem [shape: f32[8,128], index: 1, kind: output, shape index: {}]  }
   0x1   :  { %v8_v0 = vld [vmem:[%s30_s0] sm:$0xff] }
   0x2   :  { %9 = vst [vmem:[%s31_s1] sm:$0xff] %v8_v0 }

</bundles_post_ra>
